<compile_context>
chip_gen: v6e
topology: v6e:2x2x1
jax: 0.10.0
libtpu: 0.0.40
codegen_flags: <defaults>
</compile_context>

<pallas_src>
import functools

import jax
import jax.numpy as jnp
from jax.experimental import pallas as pl
from jax.experimental.pallas import tpu as pltpu


# ---------------------------------------------------------------------------
# helpers
# ---------------------------------------------------------------------------
def _tile(size, target, align):
    """Largest divisor of `size` that is <= target and a multiple of `align`.
    Falls back to the full `size` (a full-dim block is always legal)."""
    if size <= target:
        return size
    t = target - (target % align)
    while t >= align:
        if size % t == 0:
            return t
        t -= align
    return size


# ---------------------------------------------------------------------------
# Tiled / pipelined matmul used for the fused qkv projection and W_out.
# ---------------------------------------------------------------------------
def _matmul_kernel(x_ref, w_ref, o_ref, acc_ref):
    @pl.when(pl.program_id(2) == 0)
    def _():
        acc_ref[...] = jnp.zeros_like(acc_ref)

    acc_ref[...] += jnp.dot(x_ref[...], w_ref[...],
                            preferred_element_type=jnp.float32)

    @pl.when(pl.program_id(2) == pl.num_programs(2) - 1)
    def _():
        o_ref[...] = acc_ref[...].astype(o_ref.dtype)


def pallas_linear(x2d, w, *, out_dtype=jnp.float32, tm=256, tn=256, tk=256):
    m, k = x2d.shape
    k2, n = w.shape
    assert k == k2
    tm = _tile(m, tm, 8)
    tn = _tile(n, tn, 128)
    tk = _tile(k, tk, 128)
    grid = (m // tm, n // tn, k // tk)
    return pl.pallas_call(
        _matmul_kernel,
        out_shape=jax.ShapeDtypeStruct((m, n), out_dtype),
        grid=grid,
        in_specs=[pl.BlockSpec((tm, tk), lambda i, j, kk: (i, kk)),
                  pl.BlockSpec((tk, tn), lambda i, j, kk: (kk, j))],
        out_specs=pl.BlockSpec((tm, tn), lambda i, j, kk: (i, j)),
        scratch_shapes=[pltpu.VMEM((tm, tn), jnp.float32)],
        compiler_params=pltpu.CompilerParams(
            dimension_semantics=("parallel", "parallel", "arbitrary")),
    )(x2d, w)


# ---------------------------------------------------------------------------
# Flash-style neural-attention kernel.
# grid = (batch, query-tiles, key-tiles); heads are looped inside the kernel.
# Inputs (already folded):
#   a : (B, N, H*P)   query-side linear1 pre-activation (bias added in-kernel)
#   b : (B, N, H*P)   key-side   linear1 pre-activation (bias folded into `a`)
#   v : (B, N, H*dh)
# ---------------------------------------------------------------------------
def _neural_attn_kernel(a_ref, b_ref, v_ref, bias_ref,
                        w2_ref, b2_ref, w3_ref, b3_ref,
                        o_ref, m_ref, l_ref, acc_ref,
                        *, heads, proj, proj2, dh, tile_i, tile_j, causal):
    i = pl.program_id(1)
    j = pl.program_id(2)

    @pl.when(j == 0)
    def _():
        m_ref[...] = jnp.full(m_ref.shape, -jnp.inf, jnp.float32)
        l_ref[...] = jnp.zeros(l_ref.shape, jnp.float32)
        acc_ref[...] = jnp.zeros(acc_ref.shape, jnp.float32)

    def compute():
        # Combined bias of the whole q_proj/k_proj -> linear1 chain was folded
        # into bias_ref, so only one (TI, H*P) add is paid per step.
        a_all = a_ref[0].astype(jnp.float32) + bias_ref[...]       # (TI, H*P)
        b_all = b_ref[0].astype(jnp.float32)                       # (TJ, H*P)
        v_all = v_ref[0]                                           # (TJ, H*dh) bf16

        if causal:
            row = i * tile_i + jax.lax.broadcasted_iota(
                jnp.int32, (tile_i, tile_j), 0)
            col = j * tile_j + jax.lax.broadcasted_iota(
                jnp.int32, (tile_i, tile_j), 1)
            masked = col > row

        for h in range(heads):
            a_h = a_all[:, h * proj:(h + 1) * proj]                # (TI, P)
            bt_h = b_all[:, h * proj:(h + 1) * proj].T             # (P, TJ)  (XLU)

            # Pairwise MLP: stream each relu(a_i + b_j) plane straight into the
            # proj2 linear2 accumulators (only ~proj2+2 live (TI,TJ) planes),
            # initialising each accumulator from its first term.
            acc2 = [None] * proj2
            for p_i in range(proj):
                plane = jnp.maximum(
                    a_h[:, p_i:p_i + 1] + bt_h[p_i:p_i + 1, :], 0.0)
                for c in range(proj2):
                    term = plane * w2_ref[p_i, c]
                    acc2[c] = (term + b2_ref[0, c]) if p_i == 0 else acc2[c] + term
            score = None
            for c in range(proj2):
                h2 = jnp.maximum(acc2[c], 0.0)
                term = h2 * w3_ref[c, 0]
                score = (term + b3_ref[0, 0]) if c == 0 else score + term

            if causal:
                score = jnp.where(masked, -jnp.inf, score)

            # Online softmax update for this (i, j) tile / head.
            m_prev = m_ref[:, h:h + 1]
            m_new = jnp.maximum(m_prev, jnp.max(score, axis=-1, keepdims=True))
            alpha = jnp.exp(m_prev - m_new)
            p = jnp.exp(score - m_new)
            l_ref[:, h:h + 1] = (alpha * l_ref[:, h:h + 1]
                                 + jnp.sum(p, axis=-1, keepdims=True))
            v_h = v_all[:, h * dh:(h + 1) * dh]
            pv = jnp.dot(p.astype(v_h.dtype), v_h,
                         preferred_element_type=jnp.float32)
            acc_ref[:, h * dh:(h + 1) * dh] = (
                alpha * acc_ref[:, h * dh:(h + 1) * dh] + pv)
            m_ref[:, h:h + 1] = m_new

    if causal:
        # Skip key tiles that lie entirely above the diagonal (fully masked).
        live = j * tile_j <= i * tile_i + (tile_i - 1)
        pl.when(live)(compute)
    else:
        compute()

    @pl.when(j == pl.num_programs(2) - 1)
    def _():
        for h in range(heads):
            inv_l = pl.reciprocal(l_ref[:, h:h + 1], approx=True)
            acc_ref[:, h * dh:(h + 1) * dh] = (
                acc_ref[:, h * dh:(h + 1) * dh] * inv_l)
        # Output is already in 'b n (h d)' layout -> one lane-dense store.
        o_ref[0] = acc_ref[...].astype(o_ref.dtype)


# ---------------------------------------------------------------------------
# Parameter folding (exact, all-linear):
#   a_i = x_i @ (Wqkv_q_h @ Wq @ W1q) + (bq@W1q + bk@W1k + b1)
#   b_j = x_j @ (Wqkv_k_h @ Wk @ W1k)
#   linear1(cat(qp_i, kp_j)) = a_i + b_j
# Columns of Wqkv are permuted so the fused matmul output layout is
#   [A: heads*P | B: heads*P | V: heads*dh]   (head-major within each slab).
# ---------------------------------------------------------------------------
def fold_params(params, *, heads):
    dim = params["w_qkv"].shape[0]
    dh, proj = params["wq"].shape
    proj2 = params["w2"].shape[1]

    # rearrange 'b n (d k h)': column c = (d*3 + k)*heads + h
    wr = params["w_qkv"].reshape(dim, dh, 3, heads)
    cols_q = jnp.transpose(wr[:, :, 0, :], (0, 2, 1))     # (dim, heads, dh)
    cols_k = jnp.transpose(wr[:, :, 1, :], (0, 2, 1))
    cols_v = jnp.transpose(wr[:, :, 2, :], (0, 2, 1))

    fold_q = params["wq"] @ params["w1q"]                  # (dh, P)
    fold_k = params["wk"] @ params["w1k"]                  # (dh, P)
    w_a = jnp.einsum("dhe,ep->dhp", cols_q, fold_q).reshape(dim, heads * proj)
    w_b = jnp.einsum("dhe,ep->dhp", cols_k, fold_k).reshape(dim, heads * proj)
    w_v = cols_v.reshape(dim, heads * dh)
    w_big = jnp.concatenate([w_a, w_b, w_v], axis=1)

    bias = (params["bq"] @ params["w1q"] + params["bk"] @ params["w1k"]
            + params["b1"])                                # (1, P), shared by heads
    bias = jnp.tile(bias, (1, heads))                      # (1, heads*P)

    return {
        "w_big": w_big.astype(jnp.bfloat16),               # bf16 MXU operand
        "bias_a": bias.astype(jnp.float32),
        "w2": params["w2"].astype(jnp.float32),
        "b2": params["b2"].astype(jnp.float32),
        "w3": params["w3"].astype(jnp.float32),
        "b3": params["b3"].astype(jnp.float32),
        "w_out": params["w_out"].astype(jnp.bfloat16),
        "heads": heads, "dh": dh, "proj": proj, "proj2": proj2,
    }


def neural_attention(x, fp, *, causal=True, tile_i=128, tile_j=128):
    assert x.ndim == 3
    b, n, dim = x.shape
    heads, dh, proj, proj2 = fp["heads"], fp["dh"], fp["proj"], fp["proj2"]
    hp = heads * proj
    hd = heads * dh

    # Fused, lane-dense projection matmul (replaces to_qkv + q_proj/k_proj +
    # the q/k halves of linear1 + the 5-D rearrange).
    x2 = x.reshape(b * n, dim).astype(jnp.bfloat16)
    fused = pallas_linear(x2, fp["w_big"], out_dtype=jnp.bfloat16)
    fused = fused.reshape(b, n, 2 * hp + hd)
    a = fused[:, :, :hp]
    bk = fused[:, :, hp:2 * hp]
    v = fused[:, :, 2 * hp:]

    ti = _tile(n, tile_i, 8)
    tj = _tile(n, tile_j, 8)
    grid = (b, n // ti, n // tj)

    kernel = functools.partial(
        _neural_attn_kernel, heads=heads, proj=proj, proj2=proj2, dh=dh,
        tile_i=ti, tile_j=tj, causal=causal)

    vmem = pltpu.MemorySpace.VMEM
    smem = pltpu.MemorySpace.SMEM

    out = pl.pallas_call(
        kernel,
        out_shape=jax.ShapeDtypeStruct((b, n, hd), jnp.bfloat16),
        grid=grid,
        in_specs=[
            pl.BlockSpec((1, ti, hp), lambda bi, ii, ji: (bi, ii, 0)),  # a (query rows)
            pl.BlockSpec((1, tj, hp), lambda bi, ii, ji: (bi, ji, 0)),  # b (key rows)
            pl.BlockSpec((1, tj, hd), lambda bi, ii, ji: (bi, ji, 0)),  # v (key rows)
            pl.BlockSpec(memory_space=vmem),   # folded bias (1, heads*P)
            pl.BlockSpec(memory_space=smem),   # w2 (P, P2)   scalar access
            pl.BlockSpec(memory_space=smem),   # b2 (1, P2)
            pl.BlockSpec(memory_space=smem),   # w3 (P2, 1)
            pl.BlockSpec(memory_space=smem),   # b3 (1, 1)
        ],
        out_specs=pl.BlockSpec((1, ti, hd), lambda bi, ii, ji: (bi, ii, 0)),
        scratch_shapes=[
            pltpu.VMEM((ti, heads), jnp.float32),   # running max  (per head)
            pltpu.VMEM((ti, heads), jnp.float32),   # running sum  (per head)
            pltpu.VMEM((ti, hd), jnp.float32),      # output accumulator
        ],
        compiler_params=pltpu.CompilerParams(
            dimension_semantics=("parallel", "parallel", "arbitrary"),
            vmem_limit_bytes=32 * 1024 * 1024),
    )(a, bk, v, fp["bias_a"], fp["w2"], fp["b2"], fp["w3"], fp["b3"])

    # Output is already 'b n (h d)' -> straight into W_out (no transpose).
    y = pallas_linear(out.reshape(b * n, hd), fp["w_out"], out_dtype=jnp.float32)
    return y.reshape(b, n, dim)


# ---------------------------------------------------------------------------
# Deterministic synthetic parameter init (shapes per the module's __init__,
# stored in (in, out) column convention: y = x @ W + b).
# ---------------------------------------------------------------------------
def init_params(key, dim, heads, dim_head, projection_dim):
    _dim = dim_head * heads
    p = projection_dim
    p2 = p // 2
    ks = jax.random.split(key, 12)

    def w(kk, shape, scale):
        return jax.random.normal(kk, shape, jnp.float32) * scale

    params = {
        "w_qkv": w(ks[0], (dim, 3 * _dim), dim ** -0.5),
        "w_out": w(ks[1], (_dim, dim), _dim ** -0.5),
        "wq":    w(ks[2], (dim_head, p), dim_head ** -0.5),
        "bq":    w(ks[3], (1, p), 0.02),
        "wk":    w(ks[4], (dim_head, p), dim_head ** -0.5),
        "bk":    w(ks[5], (1, p), 0.02),
    }
    w1 = w(ks[6], (2 * p, p), (2 * p) ** -0.5)
    params["w1q"] = w1[:p]        # acts on projected q
    params["w1k"] = w1[p:]        # acts on projected k
    params["b1"] = w(ks[7], (1, p), 0.02)
    params["w2"] = w(ks[8], (p, p2), p ** -0.5)
    params["b2"] = w(ks[9], (1, p2), 0.02)
    params["w3"] = w(ks[10], (p2, 1), p2 ** -0.5)
    params["b3"] = w(ks[11], (1, 1), 0.02)
    return params


# Pure-JAX f32 reference that follows the PyTorch forward literally
# (validates the weight folding / column permutation / online softmax).
def reference_forward(x, params, *, heads, causal=True):
    b, n, dim = x.shape
    dh, proj = params["wq"].shape
    qkv = x @ params["w_qkv"]
    qkv = qkv.reshape(b, n, dh, 3, heads)
    qkv = jnp.transpose(qkv, (3, 0, 4, 1, 2))            # (3, b, h, n, dh)
    q, k, v = qkv[0], qkv[1], qkv[2]
    qp = q @ params["wq"] + params["bq"]
    kp = k @ params["wk"] + params["bk"]
    tq = qp @ params["w1q"]
    tk = kp @ params["w1k"]
    h1 = jax.nn.relu(tq[:, :, :, None, :] + tk[:, :, None, :, :] + params["b1"])
    h2 = jax.nn.relu(h1 @ params["w2"] + params["b2"])
    score = (h2 @ params["w3"])[..., 0] + params["b3"][0, 0]
    if causal:
        mask = jnp.triu(jnp.ones((n, n), bool), 1)
        score = jnp.where(mask, -jnp.inf, score)
    attn = jax.nn.softmax(score, axis=-1)
    out = jnp.einsum("bhij,bhjd->bhid", attn, v)
    out = jnp.transpose(out, (0, 2, 1, 3)).reshape(b, n, heads * dh)
    return out @ params["w_out"]


if __name__ == "__main__":
    key = jax.random.PRNGKey(0)
    B, N, DIM, HEADS, PROJ = 2, 16, 32, 4, 8   # dim_head = 8, projection_dim = 8
    DH = DIM // HEADS

    kx, kp = jax.random.split(key)
    x = jax.random.normal(kx, (B, N, DIM), jnp.float32)
    params = init_params(kp, DIM, HEADS, DH, PROJ)
    folded = fold_params(params, heads=HEADS)

    out = neural_attention(x, folded, causal=True)
    out = jax.block_until_ready(out)

    assert out.shape == (B, N, DIM), out.shape
    assert bool(jnp.all(jnp.isfinite(out)))

    # Loose tolerance: kernel feeds bf16 operands to the MXU (f32 accumulation);
    # a folding/permutation bug would produce O(1) discrepancies.
    ref = reference_forward(x, params, heads=HEADS, causal=True)
    err = float(jnp.max(jnp.abs(out - ref)))
    assert err < 0.2, f"max abs error vs reference: {err}"

    print("KERNEL_OK")
</pallas_src>

<mosaic_0001>
module attributes {stable_mosaic.version = 11 : i64} {
  func.func @_matmul_kernel(%arg0: i32, %arg1: i32, %arg2: i32, %arg3: memref<32x32xbf16, #tpu.memory_space<vmem>>, %arg4: memref<32x96xbf16, #tpu.memory_space<vmem>>, %arg5: memref<32x96xbf16, #tpu.memory_space<vmem>>, %arg6: memref<32x96xf32, #tpu.memory_space<vmem>>) attributes {dimension_semantics = [#tpu.dimension_semantics<parallel>, #tpu.dimension_semantics<parallel>, #tpu.dimension_semantics<arbitrary>], iteration_bounds = array<i64: 1, 1, 1>, scalar_prefetch = 0 : i64, scratch_operands = 1 : i64, tpu.core_type = #tpu.core_type<tc>, window_params = [{transform_indices = @transform_0, window_bounds = array<i64: 32, 32>}, {transform_indices = @transform_1, window_bounds = array<i64: 32, 96>}, {transform_indices = @transform_2, window_bounds = array<i64: 32, 96>}]} {
    %c0_i32 = arith.constant 0 : i32
    %0 = arith.cmpi eq, %arg2, %c0_i32 : i32
    %1 = arith.extui %0 : i1 to i32
    %c0_i32_0 = arith.constant 0 : i32
    %2 = arith.cmpi ne, %1, %c0_i32_0 : i32
    scf.if %2 {
      %cst_10 = arith.constant 0.000000e+00 : f32
      %12 = vector.broadcast %cst_10 : f32 to vector<32x96xf32>
      %c0_11 = arith.constant 0 : index
      %c0_12 = arith.constant 0 : index
      %13 = vector.load %arg6[%c0_11, %c0_12] : memref<32x96xf32, #tpu.memory_space<vmem>>, vector<32x96xf32>
      tpu.vector_store %arg6[%c0_11, %c0_12], %12 {strides = array<i32>} : memref<32x96xf32, #tpu.memory_space<vmem>>, vector<32x96xf32>,
    } else {
    }
    %c0 = arith.constant 0 : index
    %c0_1 = arith.constant 0 : index
    %3 = vector.load %arg6[%c0, %c0_1] : memref<32x96xf32, #tpu.memory_space<vmem>>, vector<32x96xf32>
    %c0_2 = arith.constant 0 : index
    %c0_3 = arith.constant 0 : index
    %4 = vector.load %arg3[%c0_2, %c0_3] : memref<32x32xbf16, #tpu.memory_space<vmem>>, vector<32x32xbf16>
    %c0_4 = arith.constant 0 : index
    %c0_5 = arith.constant 0 : index
    %5 = vector.load %arg4[%c0_4, %c0_5] : memref<32x96xbf16, #tpu.memory_space<vmem>>, vector<32x96xbf16>
    %cst = arith.constant dense<0.000000e+00> : vector<32x96xf32>
    %6 = tpu.matmul %4, %5, %cst {dimension_numbers = #tpu.dot_dimension_numbers<[1], [0], [0], [1], [0, 0, 1, 1], [], []>} : vector<32x32xbf16>, vector<32x96xbf16>, vector<32x96xf32> -> vector<32x96xf32>
    %7 = arith.addf %3, %6 : vector<32x96xf32>
    %c0_6 = arith.constant 0 : index
    %c0_7 = arith.constant 0 : index
    %8 = vector.load %arg6[%c0_6, %c0_7] : memref<32x96xf32, #tpu.memory_space<vmem>>, vector<32x96xf32>
    tpu.vector_store %arg6[%c0_6, %c0_7], %7 {strides = array<i32>} : memref<32x96xf32, #tpu.memory_space<vmem>>, vector<32x96xf32>,
    %c0_i32_8 = arith.constant 0 : i32
    %9 = arith.cmpi eq, %arg2, %c0_i32_8 : i32
    %10 = arith.extui %9 : i1 to i32
    %c0_i32_9 = arith.constant 0 : i32
    %11 = arith.cmpi ne, %10, %c0_i32_9 : i32
    scf.if %11 {
      %c0_10 = arith.constant 0 : index
      %c0_11 = arith.constant 0 : index
      %12 = vector.load %arg6[%c0_10, %c0_11] : memref<32x96xf32, #tpu.memory_space<vmem>>, vector<32x96xf32>
      %13 = arith.truncf %12 : vector<32x96xf32> to vector<32x96xbf16>
      %c0_12 = arith.constant 0 : index
      %c0_13 = arith.constant 0 : index
      %14 = vector.load %arg5[%c0_12, %c0_13] : memref<32x96xbf16, #tpu.memory_space<vmem>>, vector<32x96xbf16>
      tpu.vector_store %arg5[%c0_12, %c0_13], %13 {strides = array<i32>} : memref<32x96xbf16, #tpu.memory_space<vmem>>, vector<32x96xbf16>,
    } else {
    }
    return
  }
  func.func @transform_0(%arg0: i32, %arg1: i32, %arg2: i32) -> (i32, i32) {
    %c0_i32 = arith.constant 0 : i32
    return %arg0, %arg2 : i32, i32
  }
  func.func @transform_1(%arg0: i32, %arg1: i32, %arg2: i32) -> (i32, i32) {
    %c0_i32 = arith.constant 0 : i32
    return %arg2, %arg1 : i32, i32
  }
  func.func @transform_2(%arg0: i32, %arg1: i32, %arg2: i32) -> (i32, i32) {
    %c0_i32 = arith.constant 0 : i32
    return %arg0, %arg1 : i32, i32
  }
}

</mosaic_0001>

<bundles_post_ra>
// kernel: tpu_custom_call.1
= control target key start
LH: loop header
LB: loop body
LE: loop exit
PB: predicated region body
PF: predicated region fallthrough
CT: control target
= control target key end

     0   :  { %7 = vsyncpa [#allocation4], 0  ;;  %s344_s0 = inlined_call_operand.hbm [shape: bf16[32,32], index: 0, kind: input, shape index: {}]   ;;  %s345_s1 = inlined_call_operand.hbm [shape: bf16[32,96], index: 1, kind: input, shape index: {}]   ;;  %s346_s2 = inlined_call_operand.hbm [shape: bf16[32,96], index: 2, kind: output, shape index: {}]  }
   0x1   :  { %8 = vsyncpa [#allocation7], 0 }
   0x2   :  { %9 = vsyncpa [#allocation5], 0  ;;  %s297_s9 = smov [#allocation3]  }
   0x3   :  { %s15_s10 = sshll.u32 %s297_s9, 4  ;;  %s16_s10 = int_to_ptr.vmem [resolvable:$true] %s15_s10 }
   0x4   :  { %s239_s11 = scalar_lea.vmem %s16_s10, 256  ;;  %p244_p1 = scmp.lt.s32.totalorder %s16_s10, %s16_s10 }
   0x5   :  { %p240_p0 = scmp.ne.s32.totalorder %s16_s10, %s239_s11  ;;  %p245_p2 = scmp.lt.s32.totalorder %s239_s11, %s239_s11 }
   0x7   :  { %p246_p3 = por %p245_p2, %p244_p1 }
   0x9   :  { %p247_p4 = pnand %p246_p3, %p240_p0 }
   0xb   :  { %250 = shalt.err (!%p247_p4)
}
   0xc   :  { %s298_s12 = smov 64   ;;  %s299_s13 = smov 4  }
   0xd   :  { %21 = dma.hbm_to_vmem [thread:$0]  %s344_s0, 256, %s16_s10, [#allocation4], %s298_s12, %s298_s12, %s299_s13  }
   0xe   :  { %s300_s16 = smov [#allocation6]  }
   0xf   :  { %s27_s17 = sshll.u32 %s300_s16, 4  ;;  %s28_s17 = int_to_ptr.vmem [resolvable:$true] %s27_s17 }
  0x10   :  { %s259_s18 = scalar_lea.vmem %s28_s17, 256  ;;  %p264_p6 = scmp.lt.s32.totalorder %s28_s17, %s28_s17 }
  0x11   :  { %p260_p5 = scmp.ne.s32.totalorder %s28_s17, %s259_s18  ;;  %p265_p7 = scmp.lt.s32.totalorder %s259_s18, %s259_s18 }
  0x13   :  { %p266_p8 = por %p265_p7, %p264_p6 }
  0x15   :  { %p267_p9 = pnand %p266_p8, %p260_p5 }
  0x17   :  { %270 = shalt.err (!%p267_p9)
}
  0x18   :  { %33 = dma.hbm_to_vmem [thread:$0]  %s345_s1, 256, %s28_s17, [#allocation7], %s298_s12, %s298_s12, %s299_s13  }
  0x19   :  { %291 = dma.done.wait [#allocation4], 256  }
  0x1a   :  { %292 = vsyncadd [#allocation4], 4294967040 }
  0x1b   :  { %293 = dma.done.wait [#allocation7], 256  }
  0x1c   :  { %294 = vsyncadd [#allocation7], 4294967040  ;;  %vm45_vm0 = vcmask 785408   ;;  %v301_v0 = vmov 0.0   ;;  %v227_v1 = vld [vmem:[#allocation6 + $0x8] sm:$0xff]   ;;  %v228_v2 = vld [vmem:[#allocation6] sm:$0xff]  }
  0x1d   :  { %48 = vst.msk [vmem:[#allocation2 + $0x10] sm:$0xff] %vm45_vm0, %v301_v0  ;;  %46 = vst.msk [vmem:[#allocation2] sm:$0xff] %vm45_vm0, %v301_v0  ;;  %vm84_vm1 = vcmask 261120   ;;  %213 = vmatprep.subr.bf16.mxu0 %v227_v1  ;;  %v229_v3 = vld [vmem:[#allocation3] sm:$0xff]   ;;  %v230_v4 = vld [vmem:[#allocation3 + $0x8] sm:$0xff]   ;;  %vm172_vm2 = vcmask 781312  }
  0x1e   :  { %47 = vst.msk [vmem:[#allocation2 + $0x8] sm:$0xff] %vm45_vm0, %v301_v0  ;;  %49 = vst.msk [vmem:[#allocation2 + $0x18] sm:$0xff] %vm45_vm0, %v301_v0  ;;  %214 = vmatpush3.bf16.msra.mxu0 %v227_v1  ;;  %217 = vmatprep.mubr.msk.bf16.mxu0 %vm84_vm1, %v229_v3  ;;  %s302_s0 = smov [#allocation8]  }
  0x1f   :  { %215 = vmatprep.subr.bf16.mxu0 %v228_v2  ;;  %s182_s1 = sshll.u32 %s302_s0, 4  ;;  %s183_s1 = int_to_ptr.vmem [resolvable:$true] %s182_s1 }
  0x20   :  { %s271_s21 = scalar_lea.vmem %s183_s1, 256  ;;  %p276_p11 = scmp.lt.s32.totalorder %s183_s1, %s183_s1 }
  0x21   :  { %p272_p10 = scmp.ne.s32.totalorder %s183_s1, %s271_s21  ;;  %p277_p12 = scmp.lt.s32.totalorder %s271_s21, %s271_s21 }
  0x22   :  { %216 = vmatpush3.bf16.msra.mxu0 %v228_v2 }
  0x23   :  { %p278_p13 = por %p277_p12, %p276_p11 }
  0x24   :  { %v52_v5 = vld [vmem:[#allocation2 + $0x10] sm:$0xff]  ;;  %v50_v7 = vld [vmem:[#allocation2] sm:$0xff] }
  0x25   :  { %218 = vmatmul.mubr.msk.bf16.vlgmr.msra.gmra.mxu0 %vm84_vm1, %v230_v4  ;;  %v53_v10 = vld [vmem:[#allocation2 + $0x18] sm:$0xff]  ;;  %v51_v13 = vld [vmem:[#allocation2 + $0x8] sm:$0xff]  ;;  %p279_p0 = pnand %p278_p13, %p272_p10 }
  0xe5   :  { %v219_v6 = vpop.f32.mrf.mxu0 }
  0xe6   :  { %v142_v8 = vadd.f32 %v219_v6, %v52_v5 }
  0xe7   :  { %v125_v9 = vpop.f32.mrf.mxu0 }
  0xe8   :  { %147 = vst.msk [vmem:[#allocation2 + $0x10] sm:$0xff] %vm45_vm0, %v142_v8  ;;  %v140_v11 = vadd.f32 %v125_v9, %v50_v7 }
  0xe9   :  { %v220_v12 = vpop.f32.mrf.mxu0 }
  0xea   :  { %145 = vst.msk [vmem:[#allocation2] sm:$0xff] %vm45_vm0, %v140_v11  ;;  %v143_v14 = vadd.f32 %v220_v12, %v53_v10 }
  0xeb   :  { %v128_v15 = vpop.f32.mrf.mxu0 }
  0xec   :  { %148 = vst.msk [vmem:[#allocation2 + $0x18] sm:$0xff] %vm45_vm0, %v143_v14  ;;  %v141_v16 = vadd.f32 %v128_v15, %v51_v13 }
  0xee   :  { %146 = vst.msk [vmem:[#allocation2 + $0x8] sm:$0xff] %vm45_vm0, %v141_v16 }
  0xef   :  { %v154_v17 = vld [vmem:[#allocation2 + $0x10] sm:$0xff] }
  0xf0   :  { %v207_v18 = vpack.c.bf16 %v154_v17, %v154_v17 }
  0xf1   :  { %v152_v19 = vld [vmem:[#allocation2] sm:$0xff] }
  0xf2   :  { %v205_v20 = vpack.c.bf16 %v152_v19, %v152_v19  ;;  %175 = vst.msk [vmem:[#allocation8 + $0x8] sm:$0xf] %vm172_vm2, %v207_v18 }
  0xf3   :  { %v155_v21 = vld [vmem:[#allocation2 + $0x18] sm:$0xff] }
  0xf4   :  { %v208_v22 = vpack.c.bf16 %v155_v21, %v155_v21  ;;  %173 = vst.msk [vmem:[#allocation8] sm:$0xf] %vm172_vm2, %v205_v20 }
  0xf5   :  { %v153_v23 = vld [vmem:[#allocation2 + $0x8] sm:$0xff] }
  0xf6   :  { %v206_v24 = vpack.c.bf16 %v153_v23, %v153_v23  ;;  %176 = vst.msk [vmem:[#allocation8 + $0xc] sm:$0xf] %vm172_vm2, %v208_v22 }
  0xf8   :  { %174 = vst.msk [vmem:[#allocation8 + $0x4] sm:$0xf] %vm172_vm2, %v206_v24 }
  0xf9   :  { %282 = shalt.err (!%p279_p0)
}
  0xfa   :  { %188 = dma.vmem_to_hbm [thread:$0]  %s183_s1, 256, %s346_s2, [#allocation5], %s298_s12, %s298_s12, %s299_s13  }
  0xfb   :  { %295 = dma.done.wait [#allocation5], 256  }
  0xfc   :  { %296 = vsyncadd [#allocation5], 4294967040 }
  0xfd   :  { %192 = vsyncpa [#allocation4], 1 }
  0xfe   :  { %193 = vsyncpa [#allocation7], 1 }
  0xff   :  { %194 = vsyncpa [#allocation5], 1 }

</bundles_post_ra>
